<compile_context>
chip_gen: v5e
topology: v5e:2x2
jax: 0.10.0
libtpu: 0.0.40
codegen_flags: <defaults>
</compile_context>

<pallas_src>
import functools
import math

import jax
import jax.numpy as jnp
from jax.experimental import pallas as pl
from jax.experimental.pallas import tpu as pltpu


def _round_up(v, m):
    return ((v + m - 1) // m) * m


def _attn_mem_bank_kernel(x_ref, bias_ref, mem_s_ref, mem_t_ref, o_ref, *, apply_bias):
    # x_ref:     (TN, D_pad)      row tile of flattened (B*N) tokens
    # bias_ref:  (1, M_pad)       0 on valid slots / -1e30 on padded slots (f32)
    # mem_s_ref: (D_pad, M_pad)   memory bank with 1/sqrt(D) folded in (logits operand)
    # mem_t_ref: (M_pad, D_pad)   unscaled memory bank, transposed (read-out operand)
    # o_ref:     (TN, D_pad)
    x = x_ref[...]

    # Logits over memory slots, accumulated in f32 on the MXU: (TN, M_pad).
    logits = jnp.dot(x, mem_s_ref[...], preferred_element_type=jnp.float32)
    if apply_bias:
        # Padded (zero) mem columns must not receive softmax mass; one broadcast add.
        logits = logits + bias_ref[...]

    # Softmax over the memory-slot axis, in f32.
    m_max = jnp.max(logits, axis=-1, keepdims=True)
    p = jnp.exp(logits - m_max)
    denom = jnp.sum(p, axis=-1, keepdims=True)
    inv = pl.reciprocal(denom, approx=True)       # EUP vrcp (free slot)
    inv = inv * (2.0 - denom * inv)               # one Newton step -> ~f32-exact
    attn = (p * inv).astype(mem_t_ref.dtype)

    # Read-out: (TN, M_pad) @ (M_pad, D_pad); padded rows of mem_t are zero.
    out = jnp.dot(attn, mem_t_ref[...], preferred_element_type=jnp.float32)
    o_ref[...] = out.astype(o_ref.dtype)


def attention_memory_bank(x, mem):
    """x: (B, N, D); mem: (D, M)  ->  (B, N, D)."""
    B, N, D = x.shape
    Dm, M = mem.shape
    assert Dm == D

    R = B * N                                         # flattened token rows
    D_pad = _round_up(max(D, 128), 128)               # lane-dense last dim everywhere
    M_pad = 128 if M <= 128 else _round_up(M, 256)    # 256-aligned for v6e/v7x MXU

    itemsize = jnp.dtype(x.dtype).itemsize

    # --- VMEM budget / tile selection (v7x: 64 MiB per TC, v5e/v6e: 128 MiB) ---
    try:
        vmem_cap = int(getattr(pltpu.get_tpu_info(), "vmem_capacity_bytes", 64 << 20))
    except Exception:                                  # defensive (interpret mode etc.)
        vmem_cap = 64 << 20
    phys = min(vmem_cap, 128 << 20)
    budget = int(phys * 0.75)

    mem_bytes_1buf = 2 * D_pad * M_pad * itemsize      # both mem layouts, one buffer

    def footprint(tn, mem_bufs):
        return (4 * tn * D_pad * itemsize              # double-buffered x + out tiles
                + 4 * tn * M_pad * 4                   # f32 logits/p/attn temporaries
                + mem_bufs * mem_bytes_1buf
                + 2 * M_pad * 4)                       # bias row

    TN = 8
    for cand in (1024, 512, 256, 128, 64, 32, 16, 8):
        if footprint(cand, 1) <= budget:
            TN = cand
            break
    # Don't use a tile bigger than the (sublane-aligned) problem ...
    TN = min(TN, max(8, _round_up(R, 8)))
    # ... and give the v7x megacore (2 TCs) at least two grid steps when possible.
    if R >= 16 and -(-R // TN) < 2:
        TN = max(8, _round_up(-(-R // 2), 8))

    R_pad = _round_up(R, TN)
    vmem_limit = int(min(max(int(footprint(TN, 2) * 1.25), 32 << 20), int(phys * 0.8)))

    # --- Operand layouts (built once in HBM by the wrapper) ---
    x_flat = x.reshape(R, D)
    x_flat = jnp.pad(x_flat, ((0, R_pad - R), (0, D_pad - D)))

    mem_p = jnp.pad(mem, ((0, D_pad - D), (0, M_pad - M)))            # (D_pad, M_pad)
    scale = 1.0 / math.sqrt(D)                                        # original D
    mem_s = (mem_p * scale).astype(x.dtype)                           # scale folded in once
    mem_t = jnp.transpose(mem_p).astype(x.dtype)                      # (M_pad, D_pad)

    apply_bias = M_pad != M
    col = jnp.arange(M_pad, dtype=jnp.int32)
    bias = jnp.where(col < M, 0.0, -1e30).astype(jnp.float32).reshape(1, M_pad)

    kernel = functools.partial(_attn_mem_bank_kernel, apply_bias=apply_bias)

    def build_in_specs(mem_mode):
        kw = {} if mem_mode is None else {"pipeline_mode": mem_mode}
        return [
            pl.BlockSpec((TN, D_pad), lambda i: (i, 0)),              # streamed row tile
            pl.BlockSpec((1, M_pad), lambda i: (0, 0), **kw),         # resident bias row
            pl.BlockSpec((D_pad, M_pad), lambda i: (0, 0), **kw),     # resident scaled mem
            pl.BlockSpec((M_pad, D_pad), lambda i: (0, 0), **kw),     # resident mem^T
        ]

    def run(in_specs):
        return pl.pallas_call(
            kernel,
            out_shape=jax.ShapeDtypeStruct((R_pad, D_pad), x.dtype),
            grid=(R_pad // TN,),
            in_specs=in_specs,
            out_specs=pl.BlockSpec((TN, D_pad), lambda i: (i, 0)),
            compiler_params=pltpu.CompilerParams(
                dimension_semantics=("parallel",),      # row tiles shard across TCs
                vmem_limit_bytes=vmem_limit,
            ),
        )(x_flat, bias, mem_s, mem_t)

    try:
        # Grid-constant operands need no double buffer -> halve their VMEM use.
        out_flat = jax.block_until_ready(run(build_in_specs(pl.Buffered(1))))
    except Exception:
        # Fallback for runtimes without BlockSpec pipeline_mode support.
        out_flat = jax.block_until_ready(run(build_in_specs(None)))

    return out_flat[:R, :D].reshape(B, N, D)


def _reference(x, mem):
    # Pure-JAX mirror of the PyTorch forward (f32, highest matmul precision).
    B, N, D = x.shape
    _, M = mem.shape
    hi = jax.lax.Precision.HIGHEST
    m = jnp.broadcast_to(mem[None], (B, D, M))                        # (B, D, M)
    m_key = jnp.transpose(m, (0, 2, 1))                               # (B, M, D)
    x_ = jnp.transpose(x, (0, 2, 1))                                  # (B, D, N)
    logits = jnp.einsum("bmd,bdn->bmn", m_key, x_, precision=hi) / math.sqrt(D)
    attn = jax.nn.softmax(logits, axis=1)                             # softmax over M
    x_new = jnp.einsum("bdm,bmn->bdn", m, attn, precision=hi)         # (B, D, N)
    return jnp.transpose(x_new, (0, 2, 1))                            # (B, N, D)


if __name__ == "__main__":
    key = jax.random.PRNGKey(0)
    kx, kmem = jax.random.split(key)

    B, N, D, M = 2, 8, 32, 16

    x = jax.random.normal(kx, (B, N, D), dtype=jnp.float32)
    # nn.Parameter(torch.FloatTensor(1, dim, mem_size).normal_(0.0, 1.0)) -> (1, D, M),
    # stored here as (D, M) with deterministic init.
    mem = jax.random.normal(kmem, (D, M), dtype=jnp.float32)

    out = attention_memory_bank(x, mem)
    out = jax.block_until_ready(out)

    ref = _reference(x, mem)
    assert out.shape == (B, N, D)
    max_err = jnp.max(jnp.abs(out - ref))
    assert jnp.allclose(out, ref, atol=1e-3, rtol=1e-3), f"mismatch vs reference (max abs err {max_err})"

    print("KERNEL_OK")
</pallas_src>

<mosaic_0001>
module attributes {stable_mosaic.version = 11 : i64} {
  func.func @_attn_mem_bank_kernel(%arg0: i32, %arg1: memref<8x128xf32, #tpu.memory_space<vmem>>, %arg2: memref<1x128xf32, #tpu.memory_space<vmem>>, %arg3: memref<128x128xf32, #tpu.memory_space<vmem>>, %arg4: memref<128x128xf32, #tpu.memory_space<vmem>>, %arg5: memref<8x128xf32, #tpu.memory_space<vmem>>) attributes {dimension_semantics = [#tpu.dimension_semantics<parallel>], iteration_bounds = array<i64: 2>, scalar_prefetch = 0 : i64, scratch_operands = 0 : i64, tpu.core_type = #tpu.core_type<tc>, window_params = [{transform_indices = @transform_0, window_bounds = array<i64: 8, 128>}, {pipeline_mode = #tpu.pipeline_mode<synchronous>, transform_indices = @transform_1, window_bounds = array<i64: 1, 128>}, {pipeline_mode = #tpu.pipeline_mode<synchronous>, transform_indices = @transform_2, window_bounds = array<i64: 128, 128>}, {pipeline_mode = #tpu.pipeline_mode<synchronous>, transform_indices = @transform_3, window_bounds = array<i64: 128, 128>}, {transform_indices = @transform_4, window_bounds = array<i64: 8, 128>}]} {
    %c0 = arith.constant 0 : index
    %c0_0 = arith.constant 0 : index
    %0 = vector.load %arg1[%c0, %c0_0] : memref<8x128xf32, #tpu.memory_space<vmem>>, vector<8x128xf32>
    %c0_1 = arith.constant 0 : index
    %c0_2 = arith.constant 0 : index
    %1 = vector.load %arg3[%c0_1, %c0_2] : memref<128x128xf32, #tpu.memory_space<vmem>>, vector<128x128xf32>
    %cst = arith.constant dense<0.000000e+00> : vector<8x128xf32>
    %2 = tpu.matmul %0, %1, %cst {dimension_numbers = #tpu.dot_dimension_numbers<[1], [0], [0], [1], [0, 0, 1, 1], [], []>} : vector<8x128xf32>, vector<128x128xf32>, vector<8x128xf32> -> vector<8x128xf32>
    %c0_3 = arith.constant 0 : index
    %c0_4 = arith.constant 0 : index
    %3 = vector.load %arg2[%c0_3, %c0_4] : memref<1x128xf32, #tpu.memory_space<vmem>>, vector<1x128xf32>
    %4 = vector.broadcast %3 : vector<1x128xf32> to vector<8x128xf32>
    %5 = arith.addf %2, %4 : vector<8x128xf32>
    %cst_5 = arith.constant dense<0xFF800000> : vector<8xf32>
    %6 = vector.multi_reduction <maximumf>, %5, %cst_5 [1] : vector<8x128xf32> to vector<8xf32>
    %7 = vector.shape_cast %6 : vector<8xf32> to vector<8x1xf32>
    %8 = vector.broadcast %7 : vector<8x1xf32> to vector<8x128xf32>
    %9 = arith.subf %5, %8 : vector<8x128xf32>
    %10 = math.exp %9 : vector<8x128xf32>
    %cst_6 = arith.constant dense<0.000000e+00> : vector<8xf32>
    %11 = vector.multi_reduction <add>, %10, %cst_6 [1] : vector<8x128xf32> to vector<8xf32>
    %12 = vector.shape_cast %11 : vector<8xf32> to vector<8x1xf32>
    %13 = tpu.reciprocal %12 {approx = true} : vector<8x1xf32> -> vector<8x1xf32>
    %14 = arith.mulf %12, %13 : vector<8x1xf32>
    %cst_7 = arith.constant 2.000000e+00 : f32
    %15 = vector.broadcast %cst_7 : f32 to vector<8x1xf32>
    %16 = arith.subf %15, %14 : vector<8x1xf32>
    %17 = arith.mulf %13, %16 : vector<8x1xf32>
    %18 = vector.broadcast %17 : vector<8x1xf32> to vector<8x128xf32>
    %19 = arith.mulf %10, %18 : vector<8x128xf32>
    %c0_8 = arith.constant 0 : index
    %c0_9 = arith.constant 0 : index
    %20 = vector.load %arg4[%c0_8, %c0_9] : memref<128x128xf32, #tpu.memory_space<vmem>>, vector<128x128xf32>
    %cst_10 = arith.constant dense<0.000000e+00> : vector<8x128xf32>
    %21 = tpu.matmul %19, %20, %cst_10 {dimension_numbers = #tpu.dot_dimension_numbers<[1], [0], [0], [1], [0, 0, 1, 1], [], []>} : vector<8x128xf32>, vector<128x128xf32>, vector<8x128xf32> -> vector<8x128xf32>
    %c0_11 = arith.constant 0 : index
    %c0_12 = arith.constant 0 : index
    %22 = vector.load %arg5[%c0_11, %c0_12] : memref<8x128xf32, #tpu.memory_space<vmem>>, vector<8x128xf32>
    tpu.vector_store %arg5[%c0_11, %c0_12], %21 {strides = array<i32>} : memref<8x128xf32, #tpu.memory_space<vmem>>, vector<8x128xf32>,
    return
  }
  func.func @transform_0(%arg0: i32) -> (i32, i32) {
    %c0_i32 = arith.constant 0 : i32
    %c0_i32_0 = arith.constant 0 : i32
    return %arg0, %c0_i32 : i32, i32
  }
  func.func @transform_1(%arg0: i32) -> (i32, i32) {
    %c0_i32 = arith.constant 0 : i32
    %c0_i32_0 = arith.constant 0 : i32
    %c0_i32_1 = arith.constant 0 : i32
    return %c0_i32, %c0_i32_0 : i32, i32
  }
  func.func @transform_2(%arg0: i32) -> (i32, i32) {
    %c0_i32 = arith.constant 0 : i32
    %c0_i32_0 = arith.constant 0 : i32
    %c0_i32_1 = arith.constant 0 : i32
    return %c0_i32, %c0_i32_0 : i32, i32
  }
  func.func @transform_3(%arg0: i32) -> (i32, i32) {
    %c0_i32 = arith.constant 0 : i32
    %c0_i32_0 = arith.constant 0 : i32
    %c0_i32_1 = arith.constant 0 : i32
    return %c0_i32, %c0_i32_0 : i32, i32
  }
  func.func @transform_4(%arg0: i32) -> (i32, i32) {
    %c0_i32 = arith.constant 0 : i32
    %c0_i32_0 = arith.constant 0 : i32
    return %arg0, %c0_i32 : i32, i32
  }
}

module attributes {stable_mosaic.version = 11 : i64} {
  func.func @_attn_mem_bank_kernel(%arg0: i32, %arg1: memref<8x128xf32, #tpu.memory_space<vmem>>, %arg2: memref<1x128xf32, #tpu.memory_space<vmem>>, %arg3: memref<128x128xf32, #tpu.memory_space<vmem>>, %arg4: memref<128x128xf32, #tpu.memory_space<vmem>>, %arg5: memref<8x128xf32, #tpu.memory_space<vmem>>) attributes {dimension_semantics = [#tpu.dimension_semantics<parallel>], iteration_bounds = array<i64: 2>, scalar_prefetch = 0 : i64, scratch_operands = 0 : i64, tpu.core_type = #tpu.core_type<tc>, window_params = [{transform_indices = @transform_0, window_bounds = array<i64: 8, 128>}, {pipeline_mode = #tpu.pipeline_mode<synchronous>, transform_indices = @transform_1, window_bounds = array<i64: 1, 128>}, {pipeline_mode = #tpu.pipeline_mode<synchronous>, transform_indices = @transform_2, window_bounds = array<i64: 128, 128>}, {pipeline_mode = #tpu.pipeline_mode<synchronous>, transform_indices = @transform_3, window_bounds = array<i64: 128, 128>}, {transform_indices = @transform_4, window_bounds = array<i64: 8, 128>}]} {
    %c0 = arith.constant 0 : index
    %c0_0 = arith.constant 0 : index
    %0 = vector.load %arg1[%c0, %c0_0] : memref<8x128xf32, #tpu.memory_space<vmem>>, vector<8x128xf32>
    %c0_1 = arith.constant 0 : index
    %c0_2 = arith.constant 0 : index
    %1 = vector.load %arg3[%c0_1, %c0_2] : memref<128x128xf32, #tpu.memory_space<vmem>>, vector<128x128xf32>
    %cst = arith.constant dense<0.000000e+00> : vector<8x128xf32>
    %2 = tpu.matmul %0, %1, %cst {dimension_numbers = #tpu.dot_dimension_numbers<[1], [0], [0], [1], [0, 0, 1, 1], [], []>} : vector<8x128xf32>, vector<128x128xf32>, vector<8x128xf32> -> vector<8x128xf32>
    %c0_3 = arith.constant 0 : index
    %c0_4 = arith.constant 0 : index
    %3 = vector.load %arg2[%c0_3, %c0_4] : memref<1x128xf32, #tpu.memory_space<vmem>>, vector<1x128xf32>
    %4 = vector.broadcast %3 : vector<1x128xf32> to vector<8x128xf32>
    %5 = arith.addf %2, %4 : vector<8x128xf32>
    %cst_5 = arith.constant dense<0xFF800000> : vector<8xf32>
    %6 = vector.multi_reduction <maximumf>, %5, %cst_5 [1] : vector<8x128xf32> to vector<8xf32>
    %7 = vector.shape_cast %6 : vector<8xf32> to vector<8x1xf32>
    %8 = vector.broadcast %7 : vector<8x1xf32> to vector<8x128xf32>
    %9 = arith.subf %5, %8 : vector<8x128xf32>
    %10 = math.exp %9 : vector<8x128xf32>
    %cst_6 = arith.constant dense<0.000000e+00> : vector<8xf32>
    %11 = vector.multi_reduction <add>, %10, %cst_6 [1] : vector<8x128xf32> to vector<8xf32>
    %12 = vector.shape_cast %11 : vector<8xf32> to vector<8x1xf32>
    %13 = tpu.reciprocal %12 {approx = true} : vector<8x1xf32> -> vector<8x1xf32>
    %14 = arith.mulf %12, %13 : vector<8x1xf32>
    %cst_7 = arith.constant 2.000000e+00 : f32
    %15 = vector.broadcast %cst_7 : f32 to vector<8x1xf32>
    %16 = arith.subf %15, %14 : vector<8x1xf32>
    %17 = arith.mulf %13, %16 : vector<8x1xf32>
    %18 = vector.broadcast %17 : vector<8x1xf32> to vector<8x128xf32>
    %19 = arith.mulf %10, %18 : vector<8x128xf32>
    %c0_8 = arith.constant 0 : index
    %c0_9 = arith.constant 0 : index
    %20 = vector.load %arg4[%c0_8, %c0_9] : memref<128x128xf32, #tpu.memory_space<vmem>>, vector<128x128xf32>
    %cst_10 = arith.constant dense<0.000000e+00> : vector<8x128xf32>
    %21 = tpu.matmul %19, %20, %cst_10 {dimension_numbers = #tpu.dot_dimension_numbers<[1], [0], [0], [1], [0, 0, 1, 1], [], []>} : vector<8x128xf32>, vector<128x128xf32>, vector<8x128xf32> -> vector<8x128xf32>
    %c0_11 = arith.constant 0 : index
    %c0_12 = arith.constant 0 : index
    %22 = vector.load %arg5[%c0_11, %c0_12] : memref<8x128xf32, #tpu.memory_space<vmem>>, vector<8x128xf32>
    tpu.vector_store %arg5[%c0_11, %c0_12], %21 {strides = array<i32>} : memref<8x128xf32, #tpu.memory_space<vmem>>, vector<8x128xf32>,
    return
  }
  func.func @transform_0(%arg0: i32) -> (i32, i32) {
    %c0_i32 = arith.constant 0 : i32
    %c0_i32_0 = arith.constant 0 : i32
    return %arg0, %c0_i32 : i32, i32
  }
  func.func @transform_1(%arg0: i32) -> (i32, i32) {
    %c0_i32 = arith.constant 0 : i32
    %c0_i32_0 = arith.constant 0 : i32
    %c0_i32_1 = arith.constant 0 : i32
    return %c0_i32, %c0_i32_0 : i32, i32
  }
  func.func @transform_2(%arg0: i32) -> (i32, i32) {
    %c0_i32 = arith.constant 0 : i32
    %c0_i32_0 = arith.constant 0 : i32
    %c0_i32_1 = arith.constant 0 : i32
    return %c0_i32, %c0_i32_0 : i32, i32
  }
  func.func @transform_3(%arg0: i32) -> (i32, i32) {
    %c0_i32 = arith.constant 0 : i32
    %c0_i32_0 = arith.constant 0 : i32
    %c0_i32_1 = arith.constant 0 : i32
    return %c0_i32, %c0_i32_0 : i32, i32
  }
  func.func @transform_4(%arg0: i32) -> (i32, i32) {
    %c0_i32 = arith.constant 0 : i32
    %c0_i32_0 = arith.constant 0 : i32
    return %arg0, %c0_i32 : i32, i32
  }
}

</mosaic_0001>

<bundles_post_ra>
// kernel: tpu_custom_call.1
= control target key start
LH: loop header
LB: loop body
LE: loop exit
PB: predicated region body
PF: predicated region fallthrough
CT: control target
= control target key end

     0   :  { %9 = vsyncpa [#allocation3], 0  ;;  %s961_s0 = inlined_call_operand.hbm [shape: f32[16,128], index: 0, kind: input, shape index: {}]   ;;  %s962_s1 = inlined_call_operand.hbm [shape: f32[1,128], index: 1, kind: input, shape index: {}]   ;;  %s963_s2 = inlined_call_operand.hbm [shape: f32[128,128], index: 2, kind: input, shape index: {}]   ;;  %s964_s3 = inlined_call_operand.hbm [shape: f32[128,128], index: 3, kind: input, shape index: {}]   ;;  %s965_s4 = inlined_call_operand.hbm [shape: f32[16,128], index: 4, kind: output, shape index: {}]  }
   0x1   :  { %11 = vsyncpa [#allocation3 + $0x1], 0 }
   0x2   :  { %12 = vsyncpa [#allocation6], 0 }
   0x3   :  { %13 = vsyncpa [#allocation9], 0 }
   0x4   :  { %14 = vsyncpa [#allocation4], 0 }
   0x5   :  { %16 = vsyncpa [#allocation4 + $0x1], 0  ;;  %s796_s15 = smov 0   ;;  %s798_s16 = smov 0  }
   0x6   :  { %s800_s17 = smov 0   ;;  %s802_s18 = smov 0  }
   0x7 LB: > { %s817_s19 = sadd.s32 4294967295, %s764_s18   ;;  %s468_s20 = sadd.s32 4294967294, %s764_s18   ;;  %s764_s18 = sphi %s802_s18, %s976_s18   ;;  %s760_s17 = sphi %s800_s17, %s975_s17   ;;  %s756_s16 = sphi %s798_s16, %s974_s16   ;;  %s752_s15 = sphi %s796_s15, %s973_s15  }
   0x8   : > { %p42_p0 = scmp.ne.s32.totalorder %s756_s16, %s752_s15  ;;  %p43_p1 = scmp.eq.s32.totalorder %s817_s19, 0 }
   0x9   : > { %p129_p2 = scmp.eq.s32.totalorder %s817_s19, 1  ;;  %p135_p3 = scmp.eq.s32.totalorder %s468_s20, 1 }
   0xa   : > { %p826_p4 = por %p43_p1, %p42_p0  ;;  %p469_p5 = scmp.ge.s32.totalorder %s764_s18, 1 }
   0xb   : > { %p831_p6 = por %p135_p3, %p42_p0  ;;  %p142_p7 = scmp.lt.s32.totalorder %s764_s18, 3 }
   0xc   : > { %s154_s25 = sshll.u32 %s962_s1, 4  ;;  %s766_s27 = smov [#allocation5]   ;;  %s155_s25 = int_to_ptr.hbm [resolvable:$true] %s154_s25 }
   0xd   : > { %p839_p8 = pnand %p469_p5, %p142_p7  ;;  %s156_s28 = sshll.u32 %s766_s27, 4  ;;  %s157_s28 = int_to_ptr.vmem [resolvable:$true] %s156_s28 }
   0xe   : > { %s165_s5 = sshll.u32 %s963_s2, 4  ;;  %s767_s7 = smov [#allocation7]   ;;  %s166_s5 = int_to_ptr.hbm [resolvable:$true] %s165_s5 }
   0xf   : > { %p502_p10 = pneg %p839_p8  ;;  %s167_s8 = sshll.u32 %s767_s7, 4  ;;  %s168_s8 = int_to_ptr.vmem [resolvable:$true] %s167_s8 }
  0x10   : > { %s768_s9 = smov 128   ;;  %s769_s10 = smov 8  }
  0x11   : > { %p851_p11 = pnand %p502_p10, %p43_p1  ;;  %s179_s13 = sshll.u32 %s964_s3, 4  ;;  %s180_s13 = int_to_ptr.hbm [resolvable:$true] %s179_s13 }
  0x12   : > { %s770_s14 = smov [#allocation8]   ;;  %s865_s23 = sadd.s32 1, %s764_s18  }
  0x13   : > { %505 = dma.hbm_to_vmem [thread:$0]  (!%p851_p11), %s155_s25, 16, %s157_s28, [#allocation6]  }
  0x14   : > { %508 = dma.hbm_to_vmem [thread:$0]  (!%p851_p11), %s166_s5, 2048, %s168_s8, [#allocation6], %s768_s9, %s768_s9, %s769_s10  }
  0x15   : > { %s181_s20 = sshll.u32 %s770_s14, 4  ;;  %s26_s24 = ssub.s32 %s764_s18, %s865_s23  ;;  %s182_s20 = int_to_ptr.vmem [resolvable:$true] %s181_s20 }
  0x16   : > { %511 = dma.hbm_to_vmem [thread:$0]  (!%p851_p11), %s180_s13, 2048, %s182_s20, [#allocation9], %s768_s9, %s768_s9, %s769_s10  }
  0x17   : > { %s29_s25 = sadd.s32 1, %s760_s17  ;;  %p27_p12 = scmp.eq.s32.totalorder %s26_s24, 0 }
  0x18   : > { %p36_p13 = scmp.ne.s32.totalorder %s760_s17, %s756_s16  ;;  %p37_p0 = scmp.eq.s32.totalorder %s764_s18, 0 }
  0x19   : > { %s874_s27 = scalar_select %p27_p12, %s760_s17, %s29_s25  }
  0x1a   : > { %p878_p3 = por %p129_p2, %p36_p13  ;;  %p523_p5 = scmp.lt.s32.totalorder %s764_s18, 2 }
  0x1b   : > { %s195_s29 = sand.u32 1, %s760_s17   ;;  %s475_s30 = sshll.u32 %s764_s18, 3 }
  0x1c   : > { %p38_p7 = por %p37_p0, %p36_p13  ;;  %s474_s5 = sshll.u32 %s195_s29, 3 }
  0x1d   : > { %s203_s8 = scalar_lea.hbm %s961_s0, %s475_s30  ;;  %s199_s10 = scalar_lea.vmem [#allocation2], %s474_s5 }
  0x1e   : > { %s205_s9 = sshll.u32 %s203_s8, 4  ;;  %s207_s11 = sshll.u32 %s199_s10, 4  ;;  %s206_s9 = int_to_ptr.hbm [resolvable:$true] %s205_s9  ;;  %s208_s11 = int_to_ptr.vmem [resolvable:$true] %s207_s11 }
  0x1f   : > { %p888_p10 = pnand %p523_p5, %p38_p7  ;;  %s196_s13 = scalar_lea.sflag [#allocation3], %s195_s29 }
  0x20   : > { %s660_s14 = sshra.s32 %s206_s9, 4  ;;  %s667_s30 = scalar_lea.hbm %s961_s0, 16  ;;  %s661_s14 = int_to_ptr.hbm [resolvable:$true] %s660_s14 }
  0x21   : > { %s662_s20 = scalar_lea.hbm %s661_s14, 8  ;;  %p664_p11 = pneg %p888_p10 }
  0x22   : > { %p663_p2 = scmp.ne.s32.totalorder %s661_s14, %s662_s20  ;;  %p668_p0 = scmp.lt.s32.totalorder %s661_s14, %s961_s0 }
  0x23   : > { %p669_p5 = scmp.lt.s32.totalorder %s667_s30, %s662_s20 }
  0x24   : > { %p665_p12 = pnand %p664_p11, %p663_p2 }
  0x25   : > { %p670_p7 = por %p669_p5, %p668_p0 }
  0x26   : > { %p666_p13 = pneg %p665_p12 }
  0x28   : > { %p671_p9 = pnand %p670_p7, %p666_p13 }
  0x2a   : > { %674 = shalt.err (!%p671_p9)
}
  0x2b   : > { %515 = dma.hbm_to_vmem [thread:$0]  (!%p888_p10), %s206_s9, 128, %s208_s11, %s196_s13  }
  0x2c   : > { %216 = sbr.rel (%p839_p8) target bundleno = 601 (0x259), region = 36  ;;  %s905_s29 = sand.u32 (!%p839_p8), 1, %s756_s16  }
  0x2d   : > { %s477_s7 = sshll.u32 (!%p839_p8), %s905_s29, 3  ;;  %s219_s8 = scalar_lea.sflag (!%p839_p8), [#allocation3], %s905_s29 }
  0x2e   : > { %s911_s10 = scalar_lea.vmem (!%p839_p8), [#allocation2], %s477_s7 }
  0x31   : > { %735 = dma.done.wait (%p826_p4), %s219_s8, 128  }
  0x32   : > { %737 = vsyncadd (%p826_p4), %s219_s8, 4294967168 }
  0x33   : > { %739 = dma.done.wait (%p43_p1), [#allocation6], 2064  }
  0x34   : > { %741 = vsyncadd (%p43_p1), [#allocation6], 4294965232 }
  0x35   : > { %743 = dma.done.wait (%p43_p1), [#allocation9], 2048  }
  0x36   : > { %745 = vsyncadd (%p43_p1), [#allocation9], 4294965248  ;;  %v279_v0 = vld [vmem:[#allocation7 + $0x78] sm:$0xff]  ;;  %v278_v1 = vld [vmem:[#allocation7 + $0x70] sm:$0xff]  ;;  %s483_s21 = sshll.u32 %s817_s19, 3  ;;  %s262_s12 = scalar_lea.vmem [#allocation10], %s477_s7 }
  0x37   : > { %284 = vmatpush.msra.mxu0 %v279_v0  ;;  %v277_v2 = vld [vmem:[#allocation7 + $0x68] sm:$0xff]  ;;  %v276_v3 = vld [vmem:[#allocation7 + $0x60] sm:$0xff]  ;;  %v275_v4 = vld [vmem:[#allocation7 + $0x58] sm:$0xff]  ;;  %s364_s11 = scalar_lea.hbm %s965_s4, %s483_s21  ;;  %s366_s13 = sshll.u32 %s262_s12, 4  ;;  %s367_s13 = int_to_ptr.vmem [resolvable:$true] %s366_s13 }
  0x38   : > { %v274_v5 = vld [vmem:[#allocation7 + $0x50] sm:$0xff]  ;;  %v273_v6 = vld [vmem:[#allocation7 + $0x48] sm:$0xff]  ;;  %v272_v7 = vld [vmem:[#allocation7 + $0x40] sm:$0xff]  ;;  %s368_s14 = sshll.u32 %s364_s11, 4  ;;  %s354_s20 = scalar_lea.sflag [#allocation4], %s905_s29  ;;  %s369_s14 = int_to_ptr.hbm [resolvable:$true] %s368_s14 }
  0x39   : > { %285 = vmatpush.msra.mxu0 %v278_v1  ;;  %v271_v8 = vld [vmem:[#allocation7 + $0x38] sm:$0xff]  ;;  %v270_v9 = vld [vmem:[#allocation7 + $0x30] sm:$0xff]  ;;  %v269_v10 = vld [vmem:[#allocation7 + $0x28] sm:$0xff]  ;;  %s704_s24 = sshra.s32 %s369_s14, 4  ;;  %s710_s5 = scalar_lea.hbm %s965_s4, 16  ;;  %s705_s24 = int_to_ptr.hbm [resolvable:$true] %s704_s24 }
  0x3a   : > { %v268_v11 = vld [vmem:[#allocation7 + $0x20] sm:$0xff]  ;;  %v267_v12 = vld [vmem:[#allocation7 + $0x18] sm:$0xff]  ;;  %v266_v13 = vld [vmem:[#allocation7 + $0x10] sm:$0xff]  ;;  %s706_s25 = scalar_lea.hbm %s705_s24, 8  ;;  %p711_p9 = scmp.lt.s32.totalorder %s705_s24, %s965_s4 }
  0x3b   : > { %286 = vmatpush.msra.mxu0 %v277_v2  ;;  %v265_v14 = vld [vmem:[#allocation7 + $0x8] sm:$0xff]  ;;  %v264_v15 = vld [vmem:[#allocation7] sm:$0xff]  ;;  %v565_v17 = vld [vmem:[#allocation5] ss:$0 sm:$0xff]  ;;  %p707_p1 = scmp.ne.s32.totalorder %s705_s24, %s706_s25  ;;  %p712_p10 = scmp.lt.s32.totalorder %s710_s5, %s706_s25 }
  0x3c   : > { %v263_v16 = vld [vmem:[%s911_s10] sm:$0xff]  ;;  %v328_v23 = vld [vmem:[#allocation8 + $0x60] sm:$0xff] }
  0x3d   : > { %287 = vmatpush.msra.mxu0 %v276_v3  ;;  %v331_v20 = vld [vmem:[#allocation8 + $0x78] sm:$0xff]  ;;  %v330_v21 = vld [vmem:[#allocation8 + $0x70] sm:$0xff]  ;;  %v329_v22 = vld [vmem:[#allocation8 + $0x68] sm:$0xff]  ;;  %p708_p4 = pnand %p707_p1, %p878_p3  ;;  %p713_p2 = por %p712_p10, %p711_p9 }
  0x3e   : > { %332 = vmatpush.msra.mxu1 %v331_v20  ;;  %v327_v24 = vld [vmem:[#allocation8 + $0x58] sm:$0xff]  ;;  %v326_v25 = vld [vmem:[#allocation8 + $0x50] sm:$0xff]  ;;  %v325_v26 = vld [vmem:[#allocation8 + $0x48] sm:$0xff] }
  0x3f   : > { %288 = vmatpush.msra.mxu0 %v275_v4  ;;  %v324_v27 = vld [vmem:[#allocation8 + $0x40] sm:$0xff]  ;;  %v323_v32 = vld [vmem:[#allocation8 + $0x38] sm:$0xff]  ;;  %v322_v33 = vld [vmem:[#allocation8 + $0x30] sm:$0xff]  ;;  %p709_p8 = pneg %p708_p4 }
  0x40   : > { %333 = vmatpush.msra.mxu1 %v330_v21  ;;  %v321_v34 = vld [vmem:[#allocation8 + $0x28] sm:$0xff]  ;;  %v320_v35 = vld [vmem:[#allocation8 + $0x20] sm:$0xff]  ;;  %v319_v36 = vld [vmem:[#allocation8 + $0x18] sm:$0xff] }
  0x41   : > { %289 = vmatpush.msra.mxu0 %v274_v5  ;;  %v318_v37 = vld [vmem:[#allocation8 + $0x10] sm:$0xff]  ;;  %v317_v38 = vld [vmem:[#allocation8 + $0x8] sm:$0xff]  ;;  %v316_v39 = vld [vmem:[#allocation8] sm:$0xff]  ;;  %p714_p11 = pnand %p713_p2, %p709_p8 }
  0x42   : > { %334 = vmatpush.msra.mxu1 %v329_v22 }
  0x43   : > { %290 = vmatpush.msra.mxu0 %v273_v6 }
  0x44   : > { %335 = vmatpush.msra.mxu1 %v328_v23 }
  0x45   : > { %291 = vmatpush.msra.mxu0 %v272_v7 }
  0x46   : > { %336 = vmatpush.msra.mxu1 %v327_v24 }
  0x47   : > { %292 = vmatpush.msra.mxu0 %v271_v8 }
  0x48   : > { %337 = vmatpush.msra.mxu1 %v326_v25 }
  0x49   : > { %293 = vmatpush.msra.mxu0 %v270_v9 }
  0x4a   : > { %338 = vmatpush.msra.mxu1 %v325_v26 }
  0x4b   : > { %294 = vmatpush.msra.mxu0 %v269_v10 }
  0x4c   : > { %339 = vmatpush.msra.mxu1 %v324_v27 }
  0x4d   : > { %295 = vmatpush.msra.mxu0 %v268_v11 }
  0x4e   : > { %340 = vmatpush.msra.mxu1 %v323_v32 }
  0x4f   : > { %296 = vmatpush.msra.mxu0 %v267_v12 }
  0x50   : > { %341 = vmatpush.msra.mxu1 %v322_v33 }
  0x51   : > { %297 = vmatpush.msra.mxu0 %v266_v13 }
  0x52   : > { %342 = vmatpush.msra.mxu1 %v321_v34 }
  0x53   : > { %298 = vmatpush.msra.mxu0 %v265_v14 }
  0x54   : > { %343 = vmatpush.msra.mxu1 %v320_v35 }
  0x55   : > { %299 = vmatpush.msra.mxu0 %v264_v15 }
  0x56   : > { %300 = vmatmul.f32.vlgmr.msra.gmra.mxu0 %v263_v16  ;;  %344 = vmatpush.msra.mxu1 %v319_v36 }
  0x58   : > { %345 = vmatpush.msra.mxu1 %v318_v37 }
  0x5a   : > { %346 = vmatpush.msra.mxu1 %v317_v38 }
  0x5c   : > { %347 = vmatpush.msra.mxu1 %v316_v39 }
  0xd3   : > { %v301_v18 = vpop.f32.mrf.mxu0 }
  0xd4   : > { %v302_v19 = vadd.f32 %v565_v17, %v301_v18 }
  0xd6   : > { %304 = vmax.xlane.f32.xlu0 %v302_v19 }
 0x149   : > { %v305_v28 = vpop.xlane.xlu0 %304 }
 0x14a   : > { %v306_v29 = vsub.f32 %v302_v19, %v305_v28 }
 0x14c   : > { %v307_v30 = vmul.f32 1.442695, %v306_v29 }
 0x14e   : > { %566 = vpow2.f32 %v307_v30 }
 0x154   : > { %v567_v31 = vpop.eup %566 }
 0x155   : > { %309 = vadd.xlane.f32.xlu0 %v567_v31 }
 0x1c8   : > { %v310_v40 = vpop.xlane.xlu0 %309 }
 0x1c9   : > { %568 = vrcp.f32 %v310_v40 }
 0x1cf   : > { %v569_v41 = vpop.eup %568 }
 0x1d0   : > { %v312_v42 = vmul.f32 %v569_v41, %v310_v40 }
 0x1d2   : > { %v313_v43 = vsub.f32 2.0, %v312_v42 }
 0x1d4   : > { %v314_v44 = vmul.f32 %v569_v41, %v313_v43 }
 0x1d6   : > { %v315_v45 = vmul.f32 %v567_v31, %v314_v44 }
 0x1d8   : > { %348 = vmatmul.f32.vlgmr.msra.gmra.mxu1 %v315_v45 }
 0x255   : > { %v349_v46 = vpop.f32.mrf.mxu1 }
 0x256   : > { %352 = vst [vmem:[%s262_s12] sm:$0xff] %v349_v46 }
 0x257   : > { %717 = shalt.err (!%p714_p11)
}
 0x258   : > { %500 = dma.vmem_to_hbm [thread:$0]  (%p878_p3), %s367_s13, 128, %s369_s14, %s354_s20  }
 0x259 PF: > { %s380_s29 = sand.u32 1, %s752_s15   ;;  %p972_p12 = scmp.ge.s32.totalorder %s764_s18, 2 }
 0x25a   : > { %s381_s8 = scalar_lea.sflag [#allocation4], %s380_s29 }
 0x25b   : > { %p517_p13 = pnand %p972_p12, %p831_p6 }
 0x25d   : > { %p518_p0 = pneg %p517_p13 }
 0x25f   : > { %747 = dma.done.wait (%p518_p0), %s381_s8, 128  }
 0x260   : > { %749 = vsyncadd (%p518_p0), %s381_s8, 4294967168  ;;  %p19_p5 = scmp.ge.s32.totalorder %s865_s23, 4   ;;  %s973_s15 = smov %s756_s16 }
 0x261   : > { %s974_s16 = smov %s760_s17  ;;  %s975_s17 = smov %s874_s27 }
 0x262   : > { %s976_s18 = smov %s865_s23  ;;  %21 = sbr.rel (!%p19_p5) target bundleno = 7 (0x7), region = 93 }
 0x267   :  { %387 = vsyncpa [#allocation3], 1 }
 0x268   :  { %389 = vsyncpa [#allocation3 + $0x1], 1 }
 0x269   :  { %390 = vsyncpa [#allocation6], 1 }
 0x26a   :  { %391 = vsyncpa [#allocation9], 1 }
 0x26b   :  { %392 = vsyncpa [#allocation4], 1 }
 0x26c   :  { %394 = vsyncpa [#allocation4 + $0x1], 1 }

// kernel: tpu_custom_call.1
= control target key start
LH: loop header
LB: loop body
LE: loop exit
PB: predicated region body
PF: predicated region fallthrough
CT: control target
= control target key end

     0   :  { %9 = vsyncpa [#allocation3], 0  ;;  %s961_s0 = inlined_call_operand.hbm [shape: f32[16,128], index: 0, kind: input, shape index: {}]   ;;  %s962_s1 = inlined_call_operand.hbm [shape: f32[1,128], index: 1, kind: input, shape index: {}]   ;;  %s963_s2 = inlined_call_operand.hbm [shape: f32[128,128], index: 2, kind: input, shape index: {}]   ;;  %s964_s3 = inlined_call_operand.hbm [shape: f32[128,128], index: 3, kind: input, shape index: {}]   ;;  %s965_s4 = inlined_call_operand.hbm [shape: f32[16,128], index: 4, kind: output, shape index: {}]  }
   0x1   :  { %11 = vsyncpa [#allocation3 + $0x1], 0 }
   0x2   :  { %12 = vsyncpa [#allocation6], 0 }
   0x3   :  { %13 = vsyncpa [#allocation9], 0 }
   0x4   :  { %14 = vsyncpa [#allocation4], 0 }
   0x5   :  { %16 = vsyncpa [#allocation4 + $0x1], 0  ;;  %s796_s15 = smov 0   ;;  %s798_s16 = smov 0  }
   0x6   :  { %s800_s17 = smov 0   ;;  %s802_s18 = smov 0  }
   0x7 LB: > { %s817_s19 = sadd.s32 4294967295, %s764_s18   ;;  %s468_s20 = sadd.s32 4294967294, %s764_s18   ;;  %s764_s18 = sphi %s802_s18, %s976_s18   ;;  %s760_s17 = sphi %s800_s17, %s975_s17   ;;  %s756_s16 = sphi %s798_s16, %s974_s16   ;;  %s752_s15 = sphi %s796_s15, %s973_s15  }
   0x8   : > { %p42_p0 = scmp.ne.s32.totalorder %s756_s16, %s752_s15  ;;  %p43_p1 = scmp.eq.s32.totalorder %s817_s19, 0 }
   0x9   : > { %p129_p2 = scmp.eq.s32.totalorder %s817_s19, 1  ;;  %p135_p3 = scmp.eq.s32.totalorder %s468_s20, 1 }
   0xa   : > { %p826_p4 = por %p43_p1, %p42_p0  ;;  %p469_p5 = scmp.ge.s32.totalorder %s764_s18, 1 }
   0xb   : > { %p831_p6 = por %p135_p3, %p42_p0  ;;  %p142_p7 = scmp.lt.s32.totalorder %s764_s18, 3 }
   0xc   : > { %s154_s25 = sshll.u32 %s962_s1, 4  ;;  %s766_s27 = smov [#allocation5]   ;;  %s155_s25 = int_to_ptr.hbm [resolvable:$true] %s154_s25 }
   0xd   : > { %p839_p8 = pnand %p469_p5, %p142_p7  ;;  %s156_s28 = sshll.u32 %s766_s27, 4  ;;  %s157_s28 = int_to_ptr.vmem [resolvable:$true] %s156_s28 }
   0xe   : > { %s165_s5 = sshll.u32 %s963_s2, 4  ;;  %s767_s7 = smov [#allocation7]   ;;  %s166_s5 = int_to_ptr.hbm [resolvable:$true] %s165_s5 }
   0xf   : > { %p502_p10 = pneg %p839_p8  ;;  %s167_s8 = sshll.u32 %s767_s7, 4  ;;  %s168_s8 = int_to_ptr.vmem [resolvable:$true] %s167_s8 }
  0x10   : > { %s768_s9 = smov 128   ;;  %s769_s10 = smov 8  }
  0x11   : > { %p851_p11 = pnand %p502_p10, %p43_p1  ;;  %s179_s13 = sshll.u32 %s964_s3, 4  ;;  %s180_s13 = int_to_ptr.hbm [resolvable:$true] %s179_s13 }
  0x12   : > { %s770_s14 = smov [#allocation8]   ;;  %s865_s23 = sadd.s32 1, %s764_s18  }
  0x13   : > { %505 = dma.hbm_to_vmem [thread:$0]  (!%p851_p11), %s155_s25, 16, %s157_s28, [#allocation6]  }
  0x14   : > { %508 = dma.hbm_to_vmem [thread:$0]  (!%p851_p11), %s166_s5, 2048, %s168_s8, [#allocation6], %s768_s9, %s768_s9, %s769_s10  }
  0x15   : > { %s181_s20 = sshll.u32 %s770_s14, 4  ;;  %s26_s24 = ssub.s32 %s764_s18, %s865_s23  ;;  %s182_s20 = int_to_ptr.vmem [resolvable:$true] %s181_s20 }
  0x16   : > { %511 = dma.hbm_to_vmem [thread:$0]  (!%p851_p11), %s180_s13, 2048, %s182_s20, [#allocation9], %s768_s9, %s768_s9, %s769_s10  }
  0x17   : > { %s29_s25 = sadd.s32 1, %s760_s17  ;;  %p27_p12 = scmp.eq.s32.totalorder %s26_s24, 0 }
  0x18   : > { %p36_p13 = scmp.ne.s32.totalorder %s760_s17, %s756_s16  ;;  %p37_p0 = scmp.eq.s32.totalorder %s764_s18, 0 }
  0x19   : > { %s874_s27 = scalar_select %p27_p12, %s760_s17, %s29_s25  }
  0x1a   : > { %p878_p3 = por %p129_p2, %p36_p13  ;;  %p523_p5 = scmp.lt.s32.totalorder %s764_s18, 2 }
  0x1b   : > { %s195_s29 = sand.u32 1, %s760_s17   ;;  %s475_s30 = sshll.u32 %s764_s18, 3 }
  0x1c   : > { %p38_p7 = por %p37_p0, %p36_p13  ;;  %s474_s5 = sshll.u32 %s195_s29, 3 }
  0x1d   : > { %s203_s8 = scalar_lea.hbm %s961_s0, %s475_s30  ;;  %s199_s10 = scalar_lea.vmem [#allocation2], %s474_s5 }
  0x1e   : > { %s205_s9 = sshll.u32 %s203_s8, 4  ;;  %s207_s11 = sshll.u32 %s199_s10, 4  ;;  %s206_s9 = int_to_ptr.hbm [resolvable:$true] %s205_s9  ;;  %s208_s11 = int_to_ptr.vmem [resolvable:$true] %s207_s11 }
  0x1f   : > { %p888_p10 = pnand %p523_p5, %p38_p7  ;;  %s196_s13 = scalar_lea.sflag [#allocation3], %s195_s29 }
  0x20   : > { %s660_s14 = sshra.s32 %s206_s9, 4  ;;  %s667_s30 = scalar_lea.hbm %s961_s0, 16  ;;  %s661_s14 = int_to_ptr.hbm [resolvable:$true] %s660_s14 }
  0x21   : > { %s662_s20 = scalar_lea.hbm %s661_s14, 8  ;;  %p664_p11 = pneg %p888_p10 }
  0x22   : > { %p663_p2 = scmp.ne.s32.totalorder %s661_s14, %s662_s20  ;;  %p668_p0 = scmp.lt.s32.totalorder %s661_s14, %s961_s0 }
  0x23   : > { %p669_p5 = scmp.lt.s32.totalorder %s667_s30, %s662_s20 }
  0x24   : > { %p665_p12 = pnand %p664_p11, %p663_p2 }
  0x25   : > { %p670_p7 = por %p669_p5, %p668_p0 }
  0x26   : > { %p666_p13 = pneg %p665_p12 }
  0x28   : > { %p671_p9 = pnand %p670_p7, %p666_p13 }
  0x2a   : > { %674 = shalt.err (!%p671_p9)
}
  0x2b   : > { %515 = dma.hbm_to_vmem [thread:$0]  (!%p888_p10), %s206_s9, 128, %s208_s11, %s196_s13  }
  0x2c   : > { %216 = sbr.rel (%p839_p8) target bundleno = 601 (0x259), region = 36  ;;  %s905_s29 = sand.u32 (!%p839_p8), 1, %s756_s16  }
  0x2d   : > { %s477_s7 = sshll.u32 (!%p839_p8), %s905_s29, 3  ;;  %s219_s8 = scalar_lea.sflag (!%p839_p8), [#allocation3], %s905_s29 }
  0x2e   : > { %s911_s10 = scalar_lea.vmem (!%p839_p8), [#allocation2], %s477_s7 }
  0x31   : > { %735 = dma.done.wait (%p826_p4), %s219_s8, 128  }
  0x32   : > { %737 = vsyncadd (%p826_p4), %s219_s8, 4294967168 }
  0x33   : > { %739 = dma.done.wait (%p43_p1), [#allocation6], 2064  }
  0x34   : > { %741 = vsyncadd (%p43_p1), [#allocation6], 4294965232 }
  0x35   : > { %743 = dma.done.wait (%p43_p1), [#allocation9], 2048  }
  0x36   : > { %745 = vsyncadd (%p43_p1), [#allocation9], 4294965248  ;;  %v279_v0 = vld [vmem:[#allocation7 + $0x78] sm:$0xff]  ;;  %v278_v1 = vld [vmem:[#allocation7 + $0x70] sm:$0xff]  ;;  %s483_s21 = sshll.u32 %s817_s19, 3  ;;  %s262_s12 = scalar_lea.vmem [#allocation10], %s477_s7 }
  0x37   : > { %284 = vmatpush.msra.mxu0 %v279_v0  ;;  %v277_v2 = vld [vmem:[#allocation7 + $0x68] sm:$0xff]  ;;  %v276_v3 = vld [vmem:[#allocation7 + $0x60] sm:$0xff]  ;;  %v275_v4 = vld [vmem:[#allocation7 + $0x58] sm:$0xff]  ;;  %s364_s11 = scalar_lea.hbm %s965_s4, %s483_s21  ;;  %s366_s13 = sshll.u32 %s262_s12, 4  ;;  %s367_s13 = int_to_ptr.vmem [resolvable:$true] %s366_s13 }
  0x38   : > { %v274_v5 = vld [vmem:[#allocation7 + $0x50] sm:$0xff]  ;;  %v273_v6 = vld [vmem:[#allocation7 + $0x48] sm:$0xff]  ;;  %v272_v7 = vld [vmem:[#allocation7 + $0x40] sm:$0xff]  ;;  %s368_s14 = sshll.u32 %s364_s11, 4  ;;  %s354_s20 = scalar_lea.sflag [#allocation4], %s905_s29  ;;  %s369_s14 = int_to_ptr.hbm [resolvable:$true] %s368_s14 }
  0x39   : > { %285 = vmatpush.msra.mxu0 %v278_v1  ;;  %v271_v8 = vld [vmem:[#allocation7 + $0x38] sm:$0xff]  ;;  %v270_v9 = vld [vmem:[#allocation7 + $0x30] sm:$0xff]  ;;  %v269_v10 = vld [vmem:[#allocation7 + $0x28] sm:$0xff]  ;;  %s704_s24 = sshra.s32 %s369_s14, 4  ;;  %s710_s5 = scalar_lea.hbm %s965_s4, 16  ;;  %s705_s24 = int_to_ptr.hbm [resolvable:$true] %s704_s24 }
  0x3a   : > { %v268_v11 = vld [vmem:[#allocation7 + $0x20] sm:$0xff]  ;;  %v267_v12 = vld [vmem:[#allocation7 + $0x18] sm:$0xff]  ;;  %v266_v13 = vld [vmem:[#allocation7 + $0x10] sm:$0xff]  ;;  %s706_s25 = scalar_lea.hbm %s705_s24, 8  ;;  %p711_p9 = scmp.lt.s32.totalorder %s705_s24, %s965_s4 }
  0x3b   : > { %286 = vmatpush.msra.mxu0 %v277_v2  ;;  %v265_v14 = vld [vmem:[#allocation7 + $0x8] sm:$0xff]  ;;  %v264_v15 = vld [vmem:[#allocation7] sm:$0xff]  ;;  %v565_v17 = vld [vmem:[#allocation5] ss:$0 sm:$0xff]  ;;  %p707_p1 = scmp.ne.s32.totalorder %s705_s24, %s706_s25  ;;  %p712_p10 = scmp.lt.s32.totalorder %s710_s5, %s706_s25 }
  0x3c   : > { %v263_v16 = vld [vmem:[%s911_s10] sm:$0xff]  ;;  %v328_v23 = vld [vmem:[#allocation8 + $0x60] sm:$0xff] }
  0x3d   : > { %287 = vmatpush.msra.mxu0 %v276_v3  ;;  %v331_v20 = vld [vmem:[#allocation8 + $0x78] sm:$0xff]  ;;  %v330_v21 = vld [vmem:[#allocation8 + $0x70] sm:$0xff]  ;;  %v329_v22 = vld [vmem:[#allocation8 + $0x68] sm:$0xff]  ;;  %p708_p4 = pnand %p707_p1, %p878_p3  ;;  %p713_p2 = por %p712_p10, %p711_p9 }
  0x3e   : > { %332 = vmatpush.msra.mxu1 %v331_v20  ;;  %v327_v24 = vld [vmem:[#allocation8 + $0x58] sm:$0xff]  ;;  %v326_v25 = vld [vmem:[#allocation8 + $0x50] sm:$0xff]  ;;  %v325_v26 = vld [vmem:[#allocation8 + $0x48] sm:$0xff] }
  0x3f   : > { %288 = vmatpush.msra.mxu0 %v275_v4  ;;  %v324_v27 = vld [vmem:[#allocation8 + $0x40] sm:$0xff]  ;;  %v323_v32 = vld [vmem:[#allocation8 + $0x38] sm:$0xff]  ;;  %v322_v33 = vld [vmem:[#allocation8 + $0x30] sm:$0xff]  ;;  %p709_p8 = pneg %p708_p4 }
  0x40   : > { %333 = vmatpush.msra.mxu1 %v330_v21  ;;  %v321_v34 = vld [vmem:[#allocation8 + $0x28] sm:$0xff]  ;;  %v320_v35 = vld [vmem:[#allocation8 + $0x20] sm:$0xff]  ;;  %v319_v36 = vld [vmem:[#allocation8 + $0x18] sm:$0xff] }
  0x41   : > { %289 = vmatpush.msra.mxu0 %v274_v5  ;;  %v318_v37 = vld [vmem:[#allocation8 + $0x10] sm:$0xff]  ;;  %v317_v38 = vld [vmem:[#allocation8 + $0x8] sm:$0xff]  ;;  %v316_v39 = vld [vmem:[#allocation8] sm:$0xff]  ;;  %p714_p11 = pnand %p713_p2, %p709_p8 }
  0x42   : > { %334 = vmatpush.msra.mxu1 %v329_v22 }
  0x43   : > { %290 = vmatpush.msra.mxu0 %v273_v6 }
  0x44   : > { %335 = vmatpush.msra.mxu1 %v328_v23 }
  0x45   : > { %291 = vmatpush.msra.mxu0 %v272_v7 }
  0x46   : > { %336 = vmatpush.msra.mxu1 %v327_v24 }
  0x47   : > { %292 = vmatpush.msra.mxu0 %v271_v8 }
  0x48   : > { %337 = vmatpush.msra.mxu1 %v326_v25 }
  0x49   : > { %293 = vmatpush.msra.mxu0 %v270_v9 }
  0x4a   : > { %338 = vmatpush.msra.mxu1 %v325_v26 }
  0x4b   : > { %294 = vmatpush.msra.mxu0 %v269_v10 }
  0x4c   : > { %339 = vmatpush.msra.mxu1 %v324_v27 }
  0x4d   : > { %295 = vmatpush.msra.mxu0 %v268_v11 }
  0x4e   : > { %340 = vmatpush.msra.mxu1 %v323_v32 }
  0x4f   : > { %296 = vmatpush.msra.mxu0 %v267_v12 }
  0x50   : > { %341 = vmatpush.msra.mxu1 %v322_v33 }
  0x51   : > { %297 = vmatpush.msra.mxu0 %v266_v13 }
  0x52   : > { %342 = vmatpush.msra.mxu1 %v321_v34 }
  0x53   : > { %298 = vmatpush.msra.mxu0 %v265_v14 }
  0x54   : > { %343 = vmatpush.msra.mxu1 %v320_v35 }
  0x55   : > { %299 = vmatpush.msra.mxu0 %v264_v15 }
  0x56   : > { %300 = vmatmul.f32.vlgmr.msra.gmra.mxu0 %v263_v16  ;;  %344 = vmatpush.msra.mxu1 %v319_v36 }
  0x58   : > { %345 = vmatpush.msra.mxu1 %v318_v37 }
  0x5a   : > { %346 = vmatpush.msra.mxu1 %v317_v38 }
  0x5c   : > { %347 = vmatpush.msra.mxu1 %v316_v39 }
  0xd3   : > { %v301_v18 = vpop.f32.mrf.mxu0 }
  0xd4   : > { %v302_v19 = vadd.f32 %v565_v17, %v301_v18 }
  0xd6   : > { %304 = vmax.xlane.f32.xlu0 %v302_v19 }
 0x149   : > { %v305_v28 = vpop.xlane.xlu0 %304 }
 0x14a   : > { %v306_v29 = vsub.f32 %v302_v19, %v305_v28 }
 0x14c   : > { %v307_v30 = vmul.f32 1.442695, %v306_v29 }
 0x14e   : > { %566 = vpow2.f32 %v307_v30 }
 0x154   : > { %v567_v31 = vpop.eup %566 }
 0x155   : > { %309 = vadd.xlane.f32.xlu0 %v567_v31 }
 0x1c8   : > { %v310_v40 = vpop.xlane.xlu0 %309 }
 0x1c9   : > { %568 = vrcp.f32 %v310_v40 }
 0x1cf   : > { %v569_v41 = vpop.eup %568 }
 0x1d0   : > { %v312_v42 = vmul.f32 %v569_v41, %v310_v40 }
 0x1d2   : > { %v313_v43 = vsub.f32 2.0, %v312_v42 }
 0x1d4   : > { %v314_v44 = vmul.f32 %v569_v41, %v313_v43 }
 0x1d6   : > { %v315_v45 = vmul.f32 %v567_v31, %v314_v44 }
 0x1d8   : > { %348 = vmatmul.f32.vlgmr.msra.gmra.mxu1 %v315_v45 }
 0x255   : > { %v349_v46 = vpop.f32.mrf.mxu1 }
 0x256   : > { %352 = vst [vmem:[%s262_s12] sm:$0xff] %v349_v46 }
 0x257   : > { %717 = shalt.err (!%p714_p11)
}
 0x258   : > { %500 = dma.vmem_to_hbm [thread:$0]  (%p878_p3), %s367_s13, 128, %s369_s14, %s354_s20  }
 0x259 PF: > { %s380_s29 = sand.u32 1, %s752_s15   ;;  %p972_p12 = scmp.ge.s32.totalorder %s764_s18, 2 }
 0x25a   : > { %s381_s8 = scalar_lea.sflag [#allocation4], %s380_s29 }
 0x25b   : > { %p517_p13 = pnand %p972_p12, %p831_p6 }
 0x25d   : > { %p518_p0 = pneg %p517_p13 }
 0x25f   : > { %747 = dma.done.wait (%p518_p0), %s381_s8, 128  }
 0x260   : > { %749 = vsyncadd (%p518_p0), %s381_s8, 4294967168  ;;  %p19_p5 = scmp.ge.s32.totalorder %s865_s23, 4   ;;  %s973_s15 = smov %s756_s16 }
 0x261   : > { %s974_s16 = smov %s760_s17  ;;  %s975_s17 = smov %s874_s27 }
 0x262   : > { %s976_s18 = smov %s865_s23  ;;  %21 = sbr.rel (!%p19_p5) target bundleno = 7 (0x7), region = 93 }
 0x267   :  { %387 = vsyncpa [#allocation3], 1 }
 0x268   :  { %389 = vsyncpa [#allocation3 + $0x1], 1 }
 0x269   :  { %390 = vsyncpa [#allocation6], 1 }
 0x26a   :  { %391 = vsyncpa [#allocation9], 1 }
 0x26b   :  { %392 = vsyncpa [#allocation4], 1 }
 0x26c   :  { %394 = vsyncpa [#allocation4 + $0x1], 1 }

</bundles_post_ra>
